<compile_context>
chip_gen: v6e
topology: v6e:2x2x1
jax: 0.10.0
libtpu: 0.0.40
codegen_flags: <defaults>
</compile_context>

<pallas_src>
import functools

import jax
import jax.numpy as jnp
from jax.experimental import pallas as pl
from jax.experimental.pallas import tpu as pltpu

HIDDEN = 768
H1 = 256
H2 = 128
NUM_CLASSES = 18
C_PAD = 128            # lane-dense padded class dim (only [:, :18] meaningful)
LEAKY_SLOPE = 0.01     # nn.LeakyReLU default negative_slope


def _leaky_relu(x):
    # max(x, a*x) == leaky_relu(x) for 0 < a < 1; mul+max beats cmp+mul+select.
    return jnp.maximum(x, LEAKY_SLOPE * x)


def _classifier_kernel(x_ref, w1_ref, b1_ref, w2_ref, b2_ref, w3_ref, b3_ref,
                       o_ref):
    """Fused 3-layer MLP head for one row-tile of tokens.

    x_ref:  [tm, 768]  input dtype (f32 or bf16) — cast to bf16 in-kernel
    w*_ref: bf16 weights stored [in, out];  b*_ref: f32 biases [1, out]
    o_ref:  [tm, 128]  bf16 (lane-dense; only [:, :18] is meaningful)
    """
    x = x_ref[...].astype(jnp.bfloat16)          # no-op if encoder emits bf16

    h = jnp.dot(x, w1_ref[...], preferred_element_type=jnp.float32)
    h = _leaky_relu(h + b1_ref[...])             # f32 on VPU

    h = jnp.dot(h.astype(jnp.bfloat16), w2_ref[...],
                preferred_element_type=jnp.float32)
    h = _leaky_relu(h + b2_ref[...])

    h = jnp.dot(h.astype(jnp.bfloat16), w3_ref[...],
                preferred_element_type=jnp.float32)
    o_ref[...] = (h + b3_ref[...]).astype(o_ref.dtype)


@functools.partial(jax.jit, static_argnames=("tm", "slice_output"))
def classifier_head(x, prepared_params, *, tm=512, slice_output=True):
    """x: [N_tokens, HIDDEN] (f32 or bf16). Returns bf16 logits.

    slice_output=True  -> [N_tokens, NUM_CLASSES]
    slice_output=False -> [N_tokens, C_PAD] lane-dense slab (fuse downstream).
    """
    w1, b1, w2, b2, w3, b3 = prepared_params
    n = x.shape[0]

    # Keep at least 2 grid steps when possible so both TensorCores of a v7x
    # chip get work under dimension_semantics=("parallel",).
    if n > 8 and pl.cdiv(n, tm) < 2:
        tm = max(8, ((pl.cdiv(n, 2) + 7) // 8) * 8)

    grid = (pl.cdiv(n, tm),)
    full = lambda shape: pl.BlockSpec(shape, lambda i: (0,) * len(shape))

    flops = 2 * n * (HIDDEN * H1 + H1 * H2 + H2 * C_PAD)
    bytes_accessed = (
        n * HIDDEN * x.dtype.itemsize                 # x (native dtype)
        + (HIDDEN * H1 + H1 * H2 + H2 * C_PAD) * 2    # weights (bf16)
        + (H1 + H2 + C_PAD) * 4                       # biases (f32)
        + n * C_PAD * 2                               # output (bf16)
    )

    out = pl.pallas_call(
        _classifier_kernel,
        out_shape=jax.ShapeDtypeStruct((n, C_PAD), jnp.bfloat16),
        grid=grid,
        in_specs=[
            pl.BlockSpec((tm, HIDDEN), lambda i: (i, 0)),  # x row-tile
            full((HIDDEN, H1)),                            # w1 (VMEM-resident)
            full((1, H1)),                                 # b1
            full((H1, H2)),                                # w2
            full((1, H2)),                                 # b2
            full((H2, C_PAD)),                             # w3 (padded)
            full((1, C_PAD)),                              # b3 (padded)
        ],
        out_specs=pl.BlockSpec((tm, C_PAD), lambda i: (i, 0)),
        compiler_params=pltpu.CompilerParams(
            dimension_semantics=("parallel",)),
        cost_estimate=pl.CostEstimate(
            flops=flops, transcendentals=0, bytes_accessed=bytes_accessed),
    )(x, w1, b1, w2, b2, w3, b3)

    if slice_output:
        out = out[:, :NUM_CLASSES]
    return out


def init_classifier_params(key):
    """Deterministic init mirroring nn.Linear shapes (stored transposed)."""
    ks = jax.random.split(key, 6)

    def lin(kw, kb, fan_in, fan_out):
        bound = 1.0 / jnp.sqrt(jnp.float32(fan_in))
        w = jax.random.uniform(kw, (fan_in, fan_out), jnp.float32,
                               -bound, bound)
        b = jax.random.uniform(kb, (1, fan_out), jnp.float32, -bound, bound)
        return w, b

    w1, b1 = lin(ks[0], ks[1], HIDDEN, H1)
    w2, b2 = lin(ks[2], ks[3], H1, H2)
    w3, b3 = lin(ks[4], ks[5], H2, NUM_CLASSES)
    return (w1, b1, w2, b2, w3, b3)


def prepare_params(params):
    """Cast weights to bf16 (MXU operands) and zero-pad the class dim to 128."""
    w1, b1, w2, b2, w3, b3 = params
    w3p = jnp.zeros((H2, C_PAD), jnp.float32).at[:, :NUM_CLASSES].set(w3)
    b3p = jnp.zeros((1, C_PAD), jnp.float32).at[:, :NUM_CLASSES].set(b3)
    return (w1.astype(jnp.bfloat16), b1.astype(jnp.float32),
            w2.astype(jnp.bfloat16), b2.astype(jnp.float32),
            w3p.astype(jnp.bfloat16), b3p.astype(jnp.float32))


def reference_classifier(x, params):
    """Pure-JAX reference mirroring the kernel's dtype path (bf16 matmuls,
    f32 accumulation / bias / leaky-relu, bf16 logits)."""
    w1, b1, w2, b2, w3, b3 = params
    h = jnp.dot(x.astype(jnp.bfloat16), w1.astype(jnp.bfloat16),
                preferred_element_type=jnp.float32)
    h = _leaky_relu(h + b1)
    h = jnp.dot(h.astype(jnp.bfloat16), w2.astype(jnp.bfloat16),
                preferred_element_type=jnp.float32)
    h = _leaky_relu(h + b2)
    h = jnp.dot(h.astype(jnp.bfloat16), w3.astype(jnp.bfloat16),
                preferred_element_type=jnp.float32)
    return (h + b3).astype(jnp.bfloat16)


# TODO(synk): UtteranceWordEmbeddings (pretrained RoBERTa encoder) has no
# in-script Pallas equivalent; its per-word output embeddings are modeled here
# as the [batch, seq, hidden] input tensor fed to the classifier head.
def dialog_act_classification_prosody_forward(word_embeddings, prepared_params):
    """word_embeddings: [batch, seq, HIDDEN] -> bf16 logits [batch, seq, 18]."""
    b, s, h = word_embeddings.shape
    flat = word_embeddings.reshape(b * s, h)
    logits = classifier_head(flat, prepared_params)
    return logits.reshape(b, s, NUM_CLASSES)


if __name__ == "__main__":
    key = jax.random.PRNGKey(0)
    k_emb, k_par = jax.random.split(key)

    batch, seq = 2, 8  # small shapes; hidden stays at the module's 768
    word_emb = jax.random.normal(k_emb, (batch, seq, HIDDEN), jnp.float32)
    params = init_classifier_params(k_par)
    prepared = prepare_params(params)

    logits = dialog_act_classification_prosody_forward(word_emb, prepared)
    logits = jax.block_until_ready(logits)

    ref = reference_classifier(word_emb.reshape(-1, HIDDEN), params)
    ref = ref.reshape(batch, seq, NUM_CLASSES)

    assert logits.shape == (batch, seq, NUM_CLASSES)
    assert jnp.allclose(logits.astype(jnp.float32), ref.astype(jnp.float32),
                        atol=2e-2, rtol=2e-2)

    print("KERNEL_OK")
</pallas_src>

<mosaic_0001>
module attributes {stable_mosaic.version = 11 : i64} {
  func.func @_classifier_kernel(%arg0: i32, %arg1: memref<8x768xf32, #tpu.memory_space<vmem>>, %arg2: memref<768x256xbf16, #tpu.memory_space<vmem>>, %arg3: memref<1x256xf32, #tpu.memory_space<vmem>>, %arg4: memref<256x128xbf16, #tpu.memory_space<vmem>>, %arg5: memref<1x128xf32, #tpu.memory_space<vmem>>, %arg6: memref<128x128xbf16, #tpu.memory_space<vmem>>, %arg7: memref<1x128xf32, #tpu.memory_space<vmem>>, %arg8: memref<8x128xbf16, #tpu.memory_space<vmem>>) attributes {dimension_semantics = [#tpu.dimension_semantics<parallel>], iteration_bounds = array<i64: 2>, scalar_prefetch = 0 : i64, scratch_operands = 0 : i64, tpu.core_type = #tpu.core_type<tc>, window_params = [{transform_indices = @transform_0, window_bounds = array<i64: 8, 768>}, {pipeline_mode = #tpu.pipeline_mode<synchronous>, transform_indices = @transform_1, window_bounds = array<i64: 768, 256>}, {pipeline_mode = #tpu.pipeline_mode<synchronous>, transform_indices = @transform_2, window_bounds = array<i64: 1, 256>}, {pipeline_mode = #tpu.pipeline_mode<synchronous>, transform_indices = @transform_3, window_bounds = array<i64: 256, 128>}, {pipeline_mode = #tpu.pipeline_mode<synchronous>, transform_indices = @transform_4, window_bounds = array<i64: 1, 128>}, {pipeline_mode = #tpu.pipeline_mode<synchronous>, transform_indices = @transform_5, window_bounds = array<i64: 128, 128>}, {pipeline_mode = #tpu.pipeline_mode<synchronous>, transform_indices = @transform_6, window_bounds = array<i64: 1, 128>}, {transform_indices = @transform_7, window_bounds = array<i64: 8, 128>}]} {
    %c0 = arith.constant 0 : index
    %c0_0 = arith.constant 0 : index
    %0 = vector.load %arg1[%c0, %c0_0] : memref<8x768xf32, #tpu.memory_space<vmem>>, vector<8x768xf32>
    %1 = arith.truncf %0 : vector<8x768xf32> to vector<8x768xbf16>
    %c0_1 = arith.constant 0 : index
    %c0_2 = arith.constant 0 : index
    %2 = vector.load %arg2[%c0_1, %c0_2] : memref<768x256xbf16, #tpu.memory_space<vmem>>, vector<768x256xbf16>
    %cst = arith.constant dense<0.000000e+00> : vector<8x256xf32>
    %3 = tpu.matmul %1, %2, %cst {dimension_numbers = #tpu.dot_dimension_numbers<[1], [0], [0], [1], [0, 0, 1, 1], [], []>} : vector<8x768xbf16>, vector<768x256xbf16>, vector<8x256xf32> -> vector<8x256xf32>
    %c0_3 = arith.constant 0 : index
    %c0_4 = arith.constant 0 : index
    %4 = vector.load %arg3[%c0_3, %c0_4] : memref<1x256xf32, #tpu.memory_space<vmem>>, vector<1x256xf32>
    %5 = vector.broadcast %4 : vector<1x256xf32> to vector<8x256xf32>
    %6 = arith.addf %3, %5 : vector<8x256xf32>
    %cst_5 = arith.constant 0.00999999977 : f32
    %7 = vector.broadcast %cst_5 : f32 to vector<8x256xf32>
    %8 = arith.mulf %7, %6 : vector<8x256xf32>
    %9 = arith.maximumf %6, %8 : vector<8x256xf32>
    %10 = arith.truncf %9 : vector<8x256xf32> to vector<8x256xbf16>
    %c0_6 = arith.constant 0 : index
    %c0_7 = arith.constant 0 : index
    %11 = vector.load %arg4[%c0_6, %c0_7] : memref<256x128xbf16, #tpu.memory_space<vmem>>, vector<256x128xbf16>
    %cst_8 = arith.constant dense<0.000000e+00> : vector<8x128xf32>
    %12 = tpu.matmul %10, %11, %cst_8 {dimension_numbers = #tpu.dot_dimension_numbers<[1], [0], [0], [1], [0, 0, 1, 1], [], []>} : vector<8x256xbf16>, vector<256x128xbf16>, vector<8x128xf32> -> vector<8x128xf32>
    %c0_9 = arith.constant 0 : index
    %c0_10 = arith.constant 0 : index
    %13 = vector.load %arg5[%c0_9, %c0_10] : memref<1x128xf32, #tpu.memory_space<vmem>>, vector<1x128xf32>
    %14 = vector.broadcast %13 : vector<1x128xf32> to vector<8x128xf32>
    %15 = arith.addf %12, %14 : vector<8x128xf32>
    %cst_11 = arith.constant 0.00999999977 : f32
    %16 = vector.broadcast %cst_11 : f32 to vector<8x128xf32>
    %17 = arith.mulf %16, %15 : vector<8x128xf32>
    %18 = arith.maximumf %15, %17 : vector<8x128xf32>
    %19 = arith.truncf %18 : vector<8x128xf32> to vector<8x128xbf16>
    %c0_12 = arith.constant 0 : index
    %c0_13 = arith.constant 0 : index
    %20 = vector.load %arg6[%c0_12, %c0_13] : memref<128x128xbf16, #tpu.memory_space<vmem>>, vector<128x128xbf16>
    %cst_14 = arith.constant dense<0.000000e+00> : vector<8x128xf32>
    %21 = tpu.matmul %19, %20, %cst_14 {dimension_numbers = #tpu.dot_dimension_numbers<[1], [0], [0], [1], [0, 0, 1, 1], [], []>} : vector<8x128xbf16>, vector<128x128xbf16>, vector<8x128xf32> -> vector<8x128xf32>
    %c0_15 = arith.constant 0 : index
    %c0_16 = arith.constant 0 : index
    %22 = vector.load %arg7[%c0_15, %c0_16] : memref<1x128xf32, #tpu.memory_space<vmem>>, vector<1x128xf32>
    %23 = vector.broadcast %22 : vector<1x128xf32> to vector<8x128xf32>
    %24 = arith.addf %21, %23 : vector<8x128xf32>
    %25 = arith.truncf %24 : vector<8x128xf32> to vector<8x128xbf16>
    %c0_17 = arith.constant 0 : index
    %c0_18 = arith.constant 0 : index
    %26 = vector.load %arg8[%c0_17, %c0_18] : memref<8x128xbf16, #tpu.memory_space<vmem>>, vector<8x128xbf16>
    tpu.vector_store %arg8[%c0_17, %c0_18], %25 {strides = array<i32>} : memref<8x128xbf16, #tpu.memory_space<vmem>>, vector<8x128xbf16>,
    return
  }
  func.func @transform_0(%arg0: i32) -> (i32, i32) {
    %c0_i32 = arith.constant 0 : i32
    %c0_i32_0 = arith.constant 0 : i32
    return %arg0, %c0_i32 : i32, i32
  }
  func.func @transform_1(%arg0: i32) -> (i32, i32) {
    %c0_i32 = arith.constant 0 : i32
    %c0_i32_0 = arith.constant 0 : i32
    %c0_i32_1 = arith.constant 0 : i32
    return %c0_i32, %c0_i32_0 : i32, i32
  }
  func.func @transform_2(%arg0: i32) -> (i32, i32) {
    %c0_i32 = arith.constant 0 : i32
    %c0_i32_0 = arith.constant 0 : i32
    %c0_i32_1 = arith.constant 0 : i32
    return %c0_i32, %c0_i32_0 : i32, i32
  }
  func.func @transform_3(%arg0: i32) -> (i32, i32) {
    %c0_i32 = arith.constant 0 : i32
    %c0_i32_0 = arith.constant 0 : i32
    %c0_i32_1 = arith.constant 0 : i32
    return %c0_i32, %c0_i32_0 : i32, i32
  }
  func.func @transform_4(%arg0: i32) -> (i32, i32) {
    %c0_i32 = arith.constant 0 : i32
    %c0_i32_0 = arith.constant 0 : i32
    %c0_i32_1 = arith.constant 0 : i32
    return %c0_i32, %c0_i32_0 : i32, i32
  }
  func.func @transform_5(%arg0: i32) -> (i32, i32) {
    %c0_i32 = arith.constant 0 : i32
    %c0_i32_0 = arith.constant 0 : i32
    %c0_i32_1 = arith.constant 0 : i32
    return %c0_i32, %c0_i32_0 : i32, i32
  }
  func.func @transform_6(%arg0: i32) -> (i32, i32) {
    %c0_i32 = arith.constant 0 : i32
    %c0_i32_0 = arith.constant 0 : i32
    %c0_i32_1 = arith.constant 0 : i32
    return %c0_i32, %c0_i32_0 : i32, i32
  }
  func.func @transform_7(%arg0: i32) -> (i32, i32) {
    %c0_i32 = arith.constant 0 : i32
    %c0_i32_0 = arith.constant 0 : i32
    return %arg0, %c0_i32 : i32, i32
  }
}

</mosaic_0001>

<bundles_post_ra>
// kernel: classifier_head.1
= control target key start
LH: loop header
LB: loop body
LE: loop exit
PB: predicated region body
PF: predicated region fallthrough
CT: control target
= control target key end

     0   :  { %s2354_s0 = inlined_call_operand.hbm [shape: f32[16,768], index: 0, kind: input, shape index: {}]   ;;  %s2355_s1 = inlined_call_operand.hbm [shape: bf16[768,256], index: 1, kind: input, shape index: {}]   ;;  %s2356_s2 = inlined_call_operand.vmem [shape: f32[1,256], index: 2, kind: input, shape index: {}]   ;;  %s2357_s3 = inlined_call_operand.hbm [shape: bf16[256,128], index: 3, kind: input, shape index: {}]   ;;  %s2358_s4 = inlined_call_operand.vmem [shape: f32[1,128], index: 4, kind: input, shape index: {}]   ;;  %s2359_s5 = inlined_call_operand.hbm [shape: bf16[128,128], index: 5, kind: input, shape index: {}]   ;;  %s2360_s6 = inlined_call_operand.vmem [shape: f32[1,128], index: 6, kind: input, shape index: {}]   ;;  %s2361_s7 = inlined_call_operand.hbm [shape: bf16[16,128], index: 7, kind: output, shape index: {}]  }
   0x1   :  { %2366 = sst [smem:[#allocation15_spill]] %s2355_s1 }
   0x2   :  { %2367 = sst [smem:[#allocation16_spill]] %s2357_s3 }
   0x3   :  { %12 = vsyncpa [#allocation3], 0 }
   0x4   :  { %14 = vsyncpa [#allocation3 + $0x1], 0 }
   0x5   :  { %15 = vsyncpa [#allocation6], 0 }
   0x6   :  { %16 = vsyncpa [#allocation9], 0 }
   0x7   :  { %17 = vsyncpa [#allocation4], 0 }
   0x8   :  { %19 = vsyncpa [#allocation4 + $0x1], 0  ;;  %s2147_s24 = smov 0   ;;  %s2149_s25 = smov 0  }
   0x9   :  { %s2151_s26 = smov 0   ;;  %s2153_s27 = smov 0  }
   0xa LB: > { %s2168_s28 = sadd.s32 4294967295, %s2094_s27   ;;  %s1473_s29 = sadd.s32 4294967294, %s2094_s27   ;;  %s2094_s27 = sphi %s2153_s27, %s2389_s27   ;;  %s2090_s26 = sphi %s2151_s26, %s2388_s26   ;;  %s2086_s25 = sphi %s2149_s25, %s2387_s25   ;;  %s2082_s24 = sphi %s2147_s24, %s2386_s24  }
   0xb   : > { %p45_p0 = scmp.ne.s32.totalorder %s2086_s25, %s2082_s24  ;;  %p2362_p1 = scmp.eq.s32.totalorder %s2168_s28, 0 }
   0xc   : > { %p201_p3 = scmp.eq.s32.totalorder %s1473_s29, 1  ;;  %p1474_p5 = scmp.ge.s32.totalorder %s2094_s27, 1 }
   0xd   : > { %p2177_p4 = por %p2362_p1, %p45_p0  ;;  %p208_p7 = scmp.lt.s32.totalorder %s2094_s27, 3 }
   0xe   : > { %p2182_p6 = por %p201_p3, %p45_p0  ;;  %s2096_s10 = smov [#allocation5]  }
   0xf   : > { %s2368_s30 = scalar_select %p2177_p4, 1, 0 }
  0x10   : > { %s2369_s8 = scalar_select %p2182_p6, 1, 0 }
  0x11   : > { %p2187_p8 = pnand %p1474_p5, %p208_p7  ;;  %s220_s11 = sshll.u32 %s2096_s10, 4  ;;  %s221_s11 = int_to_ptr.vmem [resolvable:$true] %s220_s11 }
  0x12   : > { %s2097_s13 = smov [#allocation7]   ;;  %s1927_s15 = scalar_lea.vmem %s221_s11, 12288 }
  0x13   : > { %s2370_s9 = scalar_select %p2187_p8, 1, 0 }
  0x14   : > { %p1681_p9 = pneg %p2187_p8  ;;  %s236_s14 = sshll.u32 %s2097_s13, 4  ;;  %s237_s14 = int_to_ptr.vmem [resolvable:$true] %s236_s14 }
  0x15   : > { %p1928_p13 = scmp.ne.s32.totalorder %s221_s11, %s1927_s15  ;;  %p1935_p5 = scmp.lt.s32.totalorder %s221_s11, %s221_s11 }
  0x16   : > { %p2196_p11 = pnand %p1681_p9, %p2362_p1  ;;  %p1936_p7 = scmp.lt.s32.totalorder %s1927_s15, %s1927_s15 }
  0x18   : > { %p1918_p12 = pneg %p2196_p11  ;;  %p1937_p10 = por %p1936_p7, %p1935_p5 }
  0x1a   : > { %p1930_p0 = pnand %p1928_p13, %p1918_p12 }
  0x1c   : > { %p1931_p3 = pneg %p1930_p0 }
  0x1e   : > { %p1938_p9 = pnand %p1937_p10, %p1931_p3 }
  0x20   : > { %1941 = shalt.err (!%p1938_p9)
}
  0x21   : > { %s2098_s16 = smov 128   ;;  %s2099_s17 = smov 8  }
  0x22   : > { %s2372_s1 = sld [smem:[#allocation15_spill]]  ;;  %s1953_s20 = scalar_lea.vmem %s237_s14, 2048 }
  0x23   : > { %p1954_p1 = scmp.ne.s32.totalorder %s237_s14, %s1953_s20  ;;  %p1961_p2 = scmp.lt.s32.totalorder %s237_s14, %s237_s14 }
  0x24   : > { %p1962_p6 = scmp.lt.s32.totalorder %s1953_s20, %s1953_s20 }
  0x25   : > { %p1956_p13 = pnand %p1954_p1, %p1918_p12 }
  0x26   : > { %p1963_p5 = por %p1962_p6, %p1961_p2 }
  0x27   : > { %p1957_p0 = pneg %p1956_p13 }
  0x28   : > { %1684 = dma.hbm_to_vmem [thread:$0]  (!%p2196_p11), %s2372_s1, 12288, %s221_s11, [#allocation6], %s2098_s16, %s2098_s16, %s2099_s17  }
  0x29   : > { %p1964_p10 = pnand %p1963_p5, %p1957_p0 }
  0x2b   : > { %1967 = shalt.err (!%p1964_p10)
}
  0x2c   : > { %s2100_s21 = smov 64   ;;  %s2101_s22 = smov 4  }
  0x2d   : > { %s2373_s3 = sld [smem:[#allocation16_spill]]  ;;  %s2102_s10 = smov [#allocation8]  }
  0x2e   : > { %s252_s11 = sshll.u32 %s2102_s10, 4  ;;  %s2219_s13 = sadd.s32 1, %s2094_s27   ;;  %s253_s11 = int_to_ptr.vmem [resolvable:$true] %s252_s11 }
  0x2f   : > { %s1979_s15 = scalar_lea.vmem %s253_s11, 1024  ;;  %p1987_p3 = scmp.lt.s32.totalorder %s253_s11, %s253_s11 }
  0x30   : > { %p1980_p1 = scmp.ne.s32.totalorder %s253_s11, %s1979_s15  ;;  %p1988_p7 = scmp.lt.s32.totalorder %s1979_s15, %s1979_s15 }
  0x32   : > { %p1982_p2 = pnand %p1980_p1, %p1918_p12  ;;  %p1989_p9 = por %p1988_p7, %p1987_p3 }
  0x33   : > { %1687 = dma.hbm_to_vmem [thread:$0]  (!%p2196_p11), %s2373_s3, 2048, %s237_s14, [#allocation6], %s2100_s21, %s2100_s21, %s2101_s22  }
  0x34   : > { %p1983_p6 = pneg %p1982_p2 }
  0x36   : > { %p1990_p13 = pnand %p1989_p9, %p1983_p6 }
  0x38   : > { %1993 = shalt.err (!%p1990_p13)
}
  0x39   : > { %1690 = dma.hbm_to_vmem [thread:$0]  (!%p2196_p11), %s2359_s5, 1024, %s253_s11, [#allocation9], %s2100_s21, %s2100_s21, %s2101_s22  }
  0x3a   : > { %s29_s17 = ssub.s32 %s2094_s27, %s2219_s13  ;;  %s32_s18 = sadd.s32 1, %s2090_s26 }
  0x3b   : > { %p30_p12 = scmp.eq.s32.totalorder %s29_s17, 0  ;;  %p39_p0 = scmp.ne.s32.totalorder %s2090_s26, %s2086_s25 }
  0x3c   : > { %p40_p5 = scmp.eq.s32.totalorder %s2094_s27, 0  ;;  %p1702_p10 = scmp.lt.s32.totalorder %s2094_s27, 2 }
  0x3d   : > { %s2237_s12 = scalar_select %p30_p12, %s2090_s26, %s32_s18  }
  0x3e   : > { %p41_p1 = por %p40_p5, %p39_p0  ;;  %p2374_p2 = scmp.eq.s32.totalorder %s2168_s28, 1 }
  0x3f   : > { %s269_s20 = sand.u32 1, %s2090_s26   ;;  %s1663_s23 = smul.u32 768, %s2094_s27 }
  0x40   : > { %p2241_p6 = por %p2374_p2, %p39_p0  ;;  %s1662_s29 = smul.u32 48, %s269_s20 }
  0x41   : > { %p2247_p3 = pnand %p1702_p10, %p41_p1  ;;  %s2254_s11 = scalar_lea.hbm %s2354_s0, %s1663_s23 }
  0x42   : > { %s2375_s19 = scalar_select %p2241_p6, 1, 0 }
  0x43   : > { %s273_s15 = scalar_lea.vmem [#allocation2], %s1662_s29  ;;  %s270_s14 = scalar_lea.sflag [#allocation3], %s269_s20 }
  0x44   : > { %s281_s16 = sshll.u32 %s273_s15, 4  ;;  %s1994_s17 = scalar_lea.hbm %s2254_s11, 768  ;;  %s282_s16 = int_to_ptr.vmem [resolvable:$true] %s281_s16 }
  0x45   : > { %p1995_p11 = scmp.ne.s32.totalorder %s2254_s11, %s1994_s17  ;;  %p1996_p7 = pneg %p2247_p3 }
  0x46   : > { %s1999_s21 = scalar_lea.hbm %s2354_s0, 1536  ;;  %p2000_p12 = scmp.lt.s32.totalorder %s2254_s11, %s2354_s0 }
  0x47   : > { %p1997_p9 = pnand %p1996_p7, %p1995_p11  ;;  %p2001_p0 = scmp.lt.s32.totalorder %s1999_s21, %s1994_s17 }
  0x49   : > { %p1998_p13 = pneg %p1997_p9  ;;  %p2002_p5 = por %p2001_p0, %p2000_p12 }
  0x4b   : > { %p2003_p10 = pnand %p2002_p5, %p1998_p13 }
  0x4d   : > { %2006 = shalt.err (!%p2003_p10)
}
  0x4e   : > { %s2007_s29 = scalar_lea.vmem %s282_s16, 768  ;;  %s2103_s20 = smov [#allocation2]  }
  0x4f   : > { %p2008_p1 = scmp.ne.s32.totalorder %s282_s16, %s2007_s29  ;;  %s2012_s15 = sshll.u32 %s2103_s20, 4  ;;  %s2013_s15 = int_to_ptr.vmem [resolvable:$false] %s2012_s15 }
  0x50   : > { %s2014_s3 = scalar_lea.vmem %s2013_s15, 1536  ;;  %p2015_p11 = scmp.lt.s32.totalorder %s282_s16, %s2013_s15 }
  0x51   : > { %p2010_p2 = pnand %p2008_p1, %p1996_p7  ;;  %p2016_p9 = scmp.lt.s32.totalorder %s2014_s3, %s2007_s29 }
  0x53   : > { %p2011_p6 = pneg %p2010_p2  ;;  %p2017_p4 = por %p2016_p9, %p2015_p11 }
  0x55   : > { %p2018_p8 = pnand %p2017_p4, %p2011_p6 }
  0x57   : > { %2021 = shalt.err (!%p2018_p8)
}
  0x58   : > { %1694 = dma.hbm_to_vmem [thread:$0]  (!%p2247_p3), %s2254_s11, 768, %s282_s16, %s270_s14  }
  0x59   : > { %p2377_p13 = scmp.ne.s32.totalorder %s2370_s9, 0 }
  0x5a   : > { %s2273_s1 = sand.u32 (!%p2377_p13), 1, %s2086_s25   ;;  %p2378_p7 = scmp.ne.s32.totalorder (!%p2377_p13), %s2368_s30, 0 }
  0x5b   : > { %290 = sbr.rel (%p2377_p13) target bundleno = 852 (0x354), region = 48  ;;  %s293_s18 = scalar_lea.sflag (!%p2377_p13), [#allocation3], %s2273_s1 }
  0x5c   : > { %s1664_s17 = smul.u32 (!%p2377_p13), 48, %s2273_s1 }
  0x5e   : > { %s2277_s21 = scalar_lea.vmem (!%p2377_p13), [#allocation2], %s1664_s17 }
  0x60   : > { %2065 = dma.done.wait (%p2378_p7), %s293_s18, 768  }
  0x61   : > { %2067 = vsyncadd (%p2378_p7), %s293_s18, 4294966528  ;;  %p2379_p4 = scmp.eq.s32.totalorder %s2168_s28, 0 }
  0x63   : > { %2069 = dma.done.wait (%p2379_p4), [#allocation6], 14336   ;;  %p2380_p8 = pmov %p2379_p4 }
  0x64   : > { %p2381_p6 = pmov %p2379_p4 }
  0x65   : > { %2071 = vsyncadd (%p2380_p8), [#allocation6], 4294952960 }
  0x66   : > { %2073 = dma.done.wait (%p2381_p6), [#allocation9], 1024   ;;  %p2382_p3 = pmov %p2379_p4 }
  0x67   : > { %v1748_v0 = vld [vmem:[#allocation5 + $0x74] ss:$8 sps:$4 sm:$0xff]   ;;  %v1750_v1 = vld [vmem:[#allocation5 + $0x70] ss:$8 sps:$4 sm:$0xff]   ;;  %v1754_v4 = vld [vmem:[#allocation5 + $0x64] ss:$8 sps:$4 sm:$0xff]  }
  0x68   : > { %2075 = vsyncadd (%p2382_p3), [#allocation9], 4294966272  ;;  %940 = vmatprep.subr.bf16.mxu0 %v1748_v0  ;;  %v1751_v2 = vld [vmem:[#allocation5 + $0x174] ss:$8 sps:$4 sm:$0xff]   ;;  %v1753_v3 = vld [vmem:[#allocation5 + $0x170] ss:$8 sps:$4 sm:$0xff]  }
  0x69   : > { %941 = vmatpush1.bf16.msra.mxu0 %v1750_v1  ;;  %v1756_v5 = vld [vmem:[#allocation5 + $0x60] ss:$8 sps:$4 sm:$0xff]   ;;  %981 = vmatprep.subr.bf16.mxu1 %v1751_v2  ;;  %v1757_v6 = vld [vmem:[#allocation5 + $0x164] ss:$8 sps:$4 sm:$0xff]   ;;  %v1760_v8 = vld [vmem:[#allocation5 + $0x54] ss:$8 sps:$4 sm:$0xff]  }
  0x6a   : > { %982 = vmatpush1.bf16.msra.mxu1 %v1753_v3  ;;  %942 = vmatprep.subr.bf16.mxu0 %v1754_v4  ;;  %v1759_v7 = vld [vmem:[#allocation5 + $0x160] ss:$8 sps:$4 sm:$0xff]   ;;  %v1762_v9 = vld [vmem:[#allocation5 + $0x50] ss:$8 sps:$4 sm:$0xff]   ;;  %v1763_v10 = vld [vmem:[#allocation5 + $0x154] ss:$8 sps:$4 sm:$0xff]  }
  0x6b   : > { %983 = vmatprep.subr.bf16.mxu1 %v1757_v6  ;;  %v1766_v11 = vld [vmem:[#allocation5 + $0x44] ss:$8 sps:$4 sm:$0xff]   ;;  %v1765_v12 = vld [vmem:[#allocation5 + $0x150] ss:$8 sps:$4 sm:$0xff]   ;;  %v1768_v14 = vld [vmem:[#allocation5 + $0x40] ss:$8 sps:$4 sm:$0xff]  }
  0x6c   : > { %v1769_v13 = vld [vmem:[#allocation5 + $0x144] ss:$8 sps:$4 sm:$0xff]   ;;  %v1772_v15 = vld [vmem:[#allocation5 + $0x34] ss:$8 sps:$4 sm:$0xff]   ;;  %v1771_v16 = vld [vmem:[#allocation5 + $0x140] ss:$8 sps:$4 sm:$0xff]  }
  0x6d   : > { %943 = vmatpush1.bf16.msra.mxu0 %v1756_v5  ;;  %v1775_v17 = vld [vmem:[#allocation5 + $0x134] ss:$8 sps:$4 sm:$0xff]   ;;  %v1774_v18 = vld [vmem:[#allocation5 + $0x30] ss:$8 sps:$4 sm:$0xff]   ;;  %v1778_v19 = vld [vmem:[#allocation5 + $0x24] ss:$8 sps:$4 sm:$0xff]  }
  0x6e   : > { %944 = vmatprep.subr.bf16.mxu0 %v1760_v8  ;;  %984 = vmatpush1.bf16.msra.mxu1 %v1759_v7  ;;  %v1777_v20 = vld [vmem:[#allocation5 + $0x130] ss:$8 sps:$4 sm:$0xff]   ;;  %v1781_v21 = vld [vmem:[#allocation5 + $0x124] ss:$8 sps:$4 sm:$0xff]   ;;  %v1780_v22 = vld [vmem:[#allocation5 + $0x20] ss:$8 sps:$4 sm:$0xff]  }
  0x6f   : > { %985 = vmatprep.subr.bf16.mxu1 %v1763_v10  ;;  %v1784_v23 = vld [vmem:[#allocation5 + $0x14] ss:$8 sps:$4 sm:$0xff]   ;;  %v1783_v24 = vld [vmem:[#allocation5 + $0x120] ss:$8 sps:$4 sm:$0xff]   ;;  %v1786_v26 = vld [vmem:[#allocation5 + $0x10] ss:$8 sps:$4 sm:$0xff]  }
  0x70   : > { %v1787_v25 = vld [vmem:[#allocation5 + $0x114] ss:$8 sps:$4 sm:$0xff]   ;;  %v1790_v27 = vld [vmem:[#allocation5 + $0x4] ss:$8 sps:$4 sm:$0xff]   ;;  %v1789_v28 = vld [vmem:[#allocation5 + $0x110] ss:$8 sps:$4 sm:$0xff]  }
  0x71   : > { %945 = vmatpush1.bf16.msra.mxu0 %v1762_v9  ;;  %v1793_v29 = vld [vmem:[#allocation5 + $0x104] ss:$8 sps:$4 sm:$0xff]   ;;  %v1792_v30 = vld [vmem:[#allocation5] ss:$8 sps:$4 sm:$0xff]   ;;  %v1796_v31 = vld [vmem:[#allocation5 + $0xf4] ss:$8 sps:$4 sm:$0xff]  }
  0x72   : > { %946 = vmatprep.subr.bf16.mxu0 %v1766_v11  ;;  %986 = vmatpush1.bf16.msra.mxu1 %v1765_v12  ;;  %v1795_v32 = vld [vmem:[#allocation5 + $0x100] ss:$8 sps:$4 sm:$0xff]   ;;  %v1799_v33 = vld [vmem:[#allocation5 + $0x1f4] ss:$8 sps:$4 sm:$0xff]   ;;  %v1798_v34 = vld [vmem:[#allocation5 + $0xf0] ss:$8 sps:$4 sm:$0xff]  }
  0x73   : > { %987 = vmatprep.subr.bf16.mxu1 %v1769_v13  ;;  %v1802_v35 = vld [vmem:[#allocation5 + $0xe4] ss:$8 sps:$4 sm:$0xff]   ;;  %v1801_v36 = vld [vmem:[#allocation5 + $0x1f0] ss:$8 sps:$4 sm:$0xff]   ;;  %v1804_v38 = vld [vmem:[#allocation5 + $0xe0] ss:$8 sps:$4 sm:$0xff]  }
  0x74   : > { %v1805_v37 = vld [vmem:[#allocation5 + $0x1e4] ss:$8 sps:$4 sm:$0xff]   ;;  %v1808_v39 = vld [vmem:[#allocation5 + $0xd4] ss:$8 sps:$4 sm:$0xff]   ;;  %v1807_v40 = vld [vmem:[#allocation5 + $0x1e0] ss:$8 sps:$4 sm:$0xff]  }
  0x75   : > { %947 = vmatpush1.bf16.msra.mxu0 %v1768_v14  ;;  %v1811_v41 = vld [vmem:[#allocation5 + $0x1d4] ss:$8 sps:$4 sm:$0xff]   ;;  %v1810_v42 = vld [vmem:[#allocation5 + $0xd0] ss:$8 sps:$4 sm:$0xff]   ;;  %v1814_v43 = vld [vmem:[#allocation5 + $0xc4] ss:$8 sps:$4 sm:$0xff]  }
  0x76   : > { %948 = vmatprep.subr.bf16.mxu0 %v1772_v15  ;;  %988 = vmatpush1.bf16.msra.mxu1 %v1771_v16  ;;  %v1813_v44 = vld [vmem:[#allocation5 + $0x1d0] ss:$8 sps:$4 sm:$0xff]   ;;  %v1817_v45 = vld [vmem:[#allocation5 + $0x1c4] ss:$8 sps:$4 sm:$0xff]   ;;  %v1816_v47 = vld [vmem:[#allocation5 + $0xc0] ss:$8 sps:$4 sm:$0xff]  }
  0x77   : > { %989 = vmatprep.subr.bf16.mxu1 %v1775_v17  ;;  %v341_v46 = vld [vmem:[%s2277_s21 + $0x8] sm:$0xff]  ;;  %v343_v50 = vld [vmem:[%s2277_s21 + $0x18] sm:$0xff]  ;;  %v340_v4 = vld [vmem:[%s2277_s21] sm:$0xff]  ;;  %vm2105_vm0 = vmmov 0   ;;  %s1484_s11 = sshll.u32 %s2273_s1, 2  ;;  %s1608_s22 = sshll.u32 %s2168_s28, 6 }
  0x78   : > { %v347_v48 = vpack.c.bf16 %v341_v46, %v341_v46  ;;  %v1820_v49 = vld [vmem:[#allocation5 + $0xb4] ss:$8 sps:$4 sm:$0xff]   ;;  %v1819_v51 = vld [vmem:[#allocation5 + $0x1c0] ss:$8 sps:$4 sm:$0xff]   ;;  %v349_v52 = vpack.c.bf16 %v343_v50, %v343_v50  ;;  %v1822_v54 = vld [vmem:[#allocation5 + $0xb0] ss:$8 sps:$4 sm:$0xff]   ;;  %v346_v7 = vpack.c.bf16 %v340_v4, %v340_v4  ;;  %s2311_s17 = scalar_lea.hbm %s2361_s7, %s1608_s22 }
  0x79   : > { %949 = vmatpush1.bf16.msra.mxu0 %v1774_v18  ;;  %v1823_v53 = vld [vmem:[#allocation5 + $0x1b4] ss:$8 sps:$4 sm:$0xff]   ;;  %v1826_v55 = vld [vmem:[#allocation5 + $0xa4] ss:$8 sps:$4 sm:$0xff]   ;;  %v1825_v56 = vld [vmem:[#allocation5 + $0x1b0] ss:$8 sps:$4 sm:$0xff]  }
  0x7a   : > { %950 = vmatprep.subr.bf16.mxu0 %v1778_v19  ;;  %990 = vmatpush1.bf16.msra.mxu1 %v1777_v20  ;;  %v1829_v57 = vld [vmem:[#allocation5 + $0x1a4] ss:$8 sps:$4 sm:$0xff]   ;;  %v1828_v58 = vld [vmem:[#allocation5 + $0xa0] ss:$8 sps:$4 sm:$0xff]   ;;  %v1832_v59 = vld [vmem:[#allocation5 + $0x94] ss:$8 sps:$4 sm:$0xff]  }
  0x7b   : > { %991 = vmatprep.subr.bf16.mxu1 %v1781_v21  ;;  %972 = vmatprep.mubr.bf16.mxu0 %v347_v48  ;;  %v1831_v60 = vld [vmem:[#allocation5 + $0x1a0] ss:$8 sps:$4 sm:$0xff]   ;;  %v1835_v61 = vld [vmem:[#allocation5 + $0x194] ss:$8 sps:$4 sm:$0xff]   ;;  %v1834_v62 = vld [vmem:[#allocation5 + $0x90] ss:$8 sps:$4 sm:$0xff]  }
  0x7c   : > { %1013 = vmatprep.mubr.bf16.mxu1 %v349_v52  ;;  %v1838_v63 = vld [vmem:[#allocation5 + $0x84] ss:$8 sps:$4 sm:$0xff]   ;;  %v1837_v0 = vld [vmem:[#allocation5 + $0x190] ss:$8 sps:$4 sm:$0xff]   ;;  %v1840_v1 = vld [vmem:[#allocation5 + $0x80] ss:$8 sps:$4 sm:$0xff]  }
  0x7d   : > { %951 = vmatpush1.bf16.msra.mxu0 %v1780_v22  ;;  %v1841_v2 = vld [vmem:[#allocation5 + $0x184] ss:$8 sps:$4 sm:$0xff]   ;;  %v1843_v3 = vld [vmem:[#allocation5 + $0x180] ss:$8 sps:$4 sm:$0xff]   ;;  %v1846_v5 = vld [vmem:[#allocation5 + $0x274] ss:$8 sps:$4 sm:$0xff]  }
  0x7e   : > { %952 = vmatprep.subr.bf16.mxu0 %v1784_v23  ;;  %992 = vmatpush1.bf16.msra.mxu1 %v1783_v24  ;;  %v342_v6 = vld [vmem:[%s2277_s21 + $0x10] sm:$0xff]  ;;  %v345_v12 = vld [vmem:[%s2277_s21 + $0x28] sm:$0xff]  ;;  %s338_s23 = scalar_lea.vmem [#allocation10], %s1484_s11  ;;  %s1361_s18 = scalar_lea.sflag [#allocation4], %s2273_s1 }
  0x7f   : > { %993 = vmatprep.subr.bf16.mxu1 %v1787_v25  ;;  %v1844_v8 = vld [vmem:[#allocation5 + $0x270] ss:$8 sps:$4 sm:$0xff]   ;;  %v348_v9 = vpack.c.bf16 %v342_v6, %v342_v6  ;;  %v1849_v10 = vld [vmem:[#allocation5 + $0x264] ss:$8 sps:$4 sm:$0xff]   ;;  %v1847_v11 = vld [vmem:[#allocation5 + $0x260] ss:$8 sps:$4 sm:$0xff]   ;;  %v351_v14 = vpack.c.bf16 %v345_v12, %v345_v12 }
  0x80   : > { %v1852_v13 = vld [vmem:[#allocation5 + $0x254] ss:$8 sps:$4 sm:$0xff]   ;;  %v1850_v15 = vld [vmem:[#allocation5 + $0x250] ss:$8 sps:$4 sm:$0xff]   ;;  %v1855_v16 = vld [vmem:[#allocation5 + $0x244] ss:$8 sps:$4 sm:$0xff]  }
  0x81   : > { %953 = vmatpush1.bf16.msra.mxu0 %v1786_v26  ;;  %v1853_v17 = vld [vmem:[#allocation5 + $0x240] ss:$8 sps:$4 sm:$0xff]   ;;  %v1858_v18 = vld [vmem:[#allocation5 + $0x234] ss:$8 sps:$4 sm:$0xff]   ;;  %v1856_v19 = vld [vmem:[#allocation5 + $0x230] ss:$8 sps:$4 sm:$0xff]  }
  0x82   : > { %954 = vmatprep.subr.bf16.mxu0 %v1790_v27  ;;  %994 = vmatpush1.bf16.msra.mxu1 %v1789_v28  ;;  %v1861_v20 = vld [vmem:[#allocation5 + $0x224] ss:$8 sps:$4 sm:$0xff]   ;;  %v1859_v21 = vld [vmem:[#allocation5 + $0x220] ss:$8 sps:$4 sm:$0xff]   ;;  %v1864_v22 = vld [vmem:[#allocation5 + $0x214] ss:$8 sps:$4 sm:$0xff]  }
  0x83   : > { %995 = vmatprep.subr.bf16.mxu1 %v1793_v29  ;;  %v1862_v23 = vld [vmem:[#allocation5 + $0x210] ss:$8 sps:$4 sm:$0xff]   ;;  %v1867_v24 = vld [vmem:[#allocation5 + $0x204] ss:$8 sps:$4 sm:$0xff]   ;;  %v1865_v25 = vld [vmem:[#allocation5 + $0x200] ss:$8 sps:$4 sm:$0xff]  }
  0x84   : > { %v1870_v26 = vld [vmem:[#allocation5 + $0x2f4] ss:$8 sps:$4 sm:$0xff]   ;;  %v1868_v27 = vld [vmem:[#allocation5 + $0x2f0] ss:$8 sps:$4 sm:$0xff]   ;;  %v1873_v28 = vld [vmem:[#allocation5 + $0x2e4] ss:$8 sps:$4 sm:$0xff]  }
  0x85   : > { %955 = vmatpush1.bf16.msra.mxu0 %v1792_v30  ;;  %v1871_v29 = vld [vmem:[#allocation5 + $0x2e0] ss:$8 sps:$4 sm:$0xff]   ;;  %v1876_v30 = vld [vmem:[#allocation5 + $0x2d4] ss:$8 sps:$4 sm:$0xff]   ;;  %s1374_s29 = sshll.u32 %s338_s23, 4  ;;  %p2383_p0 = scmp.ne.s32.totalorder %s2375_s19, 0  ;;  %s2313_s29 = int_to_ptr.vmem [resolvable:$true] %s1374_s29 }
  0x86   : > { %956 = vmatprep.subr.bf16.mxu0 %v1796_v31  ;;  %996 = vmatpush1.bf16.msra.mxu1 %v1795_v32  ;;  %v1874_v31 = vld [vmem:[#allocation5 + $0x2d0] ss:$8 sps:$4 sm:$0xff]   ;;  %v1879_v32 = vld [vmem:[#allocation5 + $0x2c4] ss:$8 sps:$4 sm:$0xff]   ;;  %s2022_s28 = scalar_lea.vmem %s2313_s29, 64 }
  0x87   : > { %997 = vmatprep.subr.bf16.mxu1 %v1799_v33  ;;  %v1877_v33 = vld [vmem:[#allocation5 + $0x2c0] ss:$8 sps:$4 sm:$0xff]   ;;  %v1894_v46 = vld [vmem:[#allocation7 + $0x70] sm:$0xff]   ;;  %v1900_v52 = vld [vmem:[#allocation7 + $0x58] sm:$0xff]   ;;  %p2023_p12 = scmp.ne.s32.totalorder %s2313_s29, %s2022_s28 }
  0x88   : > { %v1896_v48 = vld [vmem:[#allocation7 + $0x68] sm:$0xff]   ;;  %v1898_v50 = vld [vmem:[#allocation7 + $0x60] sm:$0xff]  }
  0x89   : > { %957 = vmatpush2.bf16.msra.mxu0 %v1798_v34  ;;  %v1882_v34 = vld [vmem:[#allocation5 + $0x2b4] ss:$8 sps:$4 sm:$0xff]   ;;  %p2024_p5 = pnand %p2023_p12, %p2383_p0 }
  0x8a   : > { %958 = vmatprep.subr.bf16.mxu0 %v1802_v35  ;;  %998 = vmatpush2.bf16.msra.mxu1 %v1801_v36  ;;  %v1880_v35 = vld [vmem:[#allocation5 + $0x2b0] ss:$8 sps:$4 sm:$0xff]   ;;  %v1885_v36 = vld [vmem:[#allocation5 + $0x2a4] ss:$8 sps:$4 sm:$0xff]  }
  0x8b   : > { %999 = vmatprep.subr.bf16.mxu1 %v1805_v37  ;;  %v1883_v37 = vld [vmem:[#allocation5 + $0x2a0] ss:$8 sps:$4 sm:$0xff]   ;;  %p2025_p10 = pneg %p2024_p5 }
  0x8d   : > { %959 = vmatpush2.bf16.msra.mxu0 %v1804_v38  ;;  %v1888_v38 = vld [vmem:[#allocation5 + $0x294] ss:$8 sps:$4 sm:$0xff]  }
  0x8e   : > { %960 = vmatprep.subr.bf16.mxu0 %v1808_v39  ;;  %1000 = vmatpush2.bf16.msra.mxu1 %v1807_v40  ;;  %v1886_v39 = vld [vmem:[#allocation5 + $0x290] ss:$8 sps:$4 sm:$0xff]   ;;  %v1891_v40 = vld [vmem:[#allocation5 + $0x284] ss:$8 sps:$4 sm:$0xff]  }
  0x8f   : > { %1001 = vmatprep.subr.bf16.mxu1 %v1811_v41  ;;  %v1889_v41 = vld [vmem:[#allocation5 + $0x280] ss:$8 sps:$4 sm:$0xff]  }
  0x91   : > { %961 = vmatpush2.bf16.msra.mxu0 %v1810_v42  ;;  %v344_v42 = vld [vmem:[%s2277_s21 + $0x20] sm:$0xff]  ;;  %s2106_s21 = smov [#allocation10]  }
  0x92   : > { %962 = vmatprep.subr.bf16.mxu0 %v1814_v43  ;;  %1002 = vmatpush2.bf16.msra.mxu1 %v1813_v44  ;;  %v350_v43 = vpack.c.bf16 %v344_v42, %v344_v42  ;;  %v1892_v44 = vld [vmem:[#allocation7 + $0x78] sm:$0xff]   ;;  %s2026_s3 = sshll.u32 %s2106_s21, 4  ;;  %s2027_s3 = int_to_ptr.vmem [resolvable:$false] %s2026_s3 }
  0x93   : > { %1003 = vmatprep.subr.bf16.mxu1 %v1817_v45  ;;  %v1893_v45 = vld [vmem:[#allocation7 + $0x38] sm:$0xff]   ;;  %s2028_s30 = scalar_lea.vmem %s2027_s3, 128  ;;  %p2029_p1 = scmp.lt.s32.totalorder %s2313_s29, %s2027_s3 }
  0x94   : > { %p2030_p2 = scmp.lt.s32.totalorder %s2028_s30, %s2022_s28 }
  0x95   : > { %963 = vmatpush2.bf16.msra.mxu0 %v1816_v47  ;;  %v1895_v47 = vld [vmem:[#allocation7 + $0x30] sm:$0xff]  }
  0x96   : > { %964 = vmatprep.subr.bf16.mxu0 %v1820_v49  ;;  %1004 = vmatpush2.bf16.msra.mxu1 %v1819_v51  ;;  %v1897_v49 = vld [vmem:[#allocation7 + $0x28] sm:$0xff]   ;;  %v1899_v51 = vld [vmem:[#allocation7 + $0x20] sm:$0xff]   ;;  %p2031_p11 = por %p2030_p2, %p2029_p1 }
  0x97   : > { %1005 = vmatprep.subr.bf16.mxu1 %v1823_v53  ;;  %v1901_v53 = vld [vmem:[#allocation7 + $0x18] sm:$0xff]  }
  0x98   : > { %p2032_p9 = pnand %p2031_p11, %p2025_p10 }
  0x99   : > { %965 = vmatpush2.bf16.msra.mxu0 %v1822_v54  ;;  %v1902_v54 = vld [vmem:[#allocation7 + $0x50] sm:$0xff]  }
  0x9a   : > { %966 = vmatprep.subr.bf16.mxu0 %v1826_v55  ;;  %1006 = vmatpush2.bf16.msra.mxu1 %v1825_v56  ;;  %v1903_v55 = vld [vmem:[#allocation7 + $0x10] sm:$0xff]   ;;  %v1904_v56 = vld [vmem:[#allocation7 + $0x48] sm:$0xff]  }
  0x9b   : > { %1007 = vmatprep.subr.bf16.mxu1 %v1829_v57  ;;  %v1905_v57 = vld [vmem:[#allocation7 + $0x8] sm:$0xff]  }
  0x9d   : > { %967 = vmatpush2.bf16.msra.mxu0 %v1828_v58  ;;  %v1906_v58 = vld [vmem:[#allocation7 + $0x40] sm:$0xff]  }
  0x9e   : > { %968 = vmatprep.subr.bf16.mxu0 %v1832_v59  ;;  %1008 = vmatpush2.bf16.msra.mxu1 %v1831_v60  ;;  %v1907_v59 = vld [vmem:[#allocation7] sm:$0xff]   ;;  %v2104_v60 = vmov 0.0  }
  0x9f   : > { %1009 = vmatprep.subr.bf16.mxu1 %v1835_v61 }
  0xa1   : > { %969 = vmatpush2.bf16.msra.mxu0 %v1834_v62 }
  0xa2   : > { %970 = vmatprep.subr.bf16.mxu0 %v1838_v63  ;;  %1010 = vmatpush2.bf16.msra.mxu1 %v1837_v0 }
  0xa3   : > { %1011 = vmatprep.subr.bf16.mxu1 %v1841_v2 }
  0xa5   : > { %971 = vmatpush2.bf16.msra.mxu0 %v1840_v1 }
  0xa6   : > { %1022 = vmatprep.subr.bf16.mxu0 %v1846_v5  ;;  %1012 = vmatpush2.bf16.msra.mxu1 %v1843_v3  ;;  %v450_v5 = vlaneseq }
  0xa7   : > { %1611 = vmatprep.subr.bf16.mxu1 %v1892_v44 }
  0xa8   : > { %973 = vmatmul.mubr.bf16.vlgmr.msra.gmra.mxu0 %v346_v7  ;;  %v451_v6 = vshrl.u32 %v450_v5, 7 }
  0xa9   : > { %1023 = vmatpush1.bf16.msra.mxu0 %v1844_v8  ;;  %1014 = vmatmul.mubr.bf16.vlgmr.msra.gmra.mxu1 %v348_v9  ;;  %v448_v8 = vld [vmem:[%s2356_s2] sm:$0x3] }
  0xaa   : > { %1024 = vmatprep.subr.bf16.mxu0 %v1849_v10  ;;  %1054 = vmatprep.mubr.bf16.mxu0 %v351_v14  ;;  %v452_v7 = vsub.s32 0, %v451_v6  ;;  %v456_v9 = vsub.s32 1, %v451_v6 }
  0xab   : > { %1612 = vmatpush3.bf16.msra.mxu1 %v1893_v45 }
  0xac   : > { %1613 = vmatprep.subr.bf16.mxu1 %v1894_v46  ;;  %v453_v10 = vrot.slane %v448_v8, %v452_v7  ;;  %v1598_v46 = vld [vmem:[%s2360_s6] ss:$0 sm:$0xff] }
  0xad   : > { %1025 = vmatpush1.bf16.msra.mxu0 %v1847_v11  ;;  %v457_v11 = vrot.slane %v448_v8, %v456_v9 }
  0xae   : > { %1026 = vmatprep.subr.bf16.mxu0 %v1852_v13 }
  0xaf   : > { %1614 = vmatpush3.bf16.msra.mxu1 %v1895_v47 }
  0xb0   : > { %1615 = vmatprep.subr.bf16.mxu1 %v1896_v48 }
  0xb1   : > { %1027 = vmatpush1.bf16.msra.mxu0 %v1850_v15 }
  0xb2   : > { %1028 = vmatprep.subr.bf16.mxu0 %v1855_v16 }
  0xb3   : > { %1616 = vmatpush3.bf16.msra.mxu1 %v1897_v49 }
  0xb4   : > { %1617 = vmatprep.subr.bf16.mxu1 %v1898_v50 }
  0xb5   : > { %1029 = vmatpush1.bf16.msra.mxu0 %v1853_v17 }
  0xb6   : > { %1030 = vmatprep.subr.bf16.mxu0 %v1858_v18 }
  0xb7   : > { %1618 = vmatpush3.bf16.msra.mxu1 %v1899_v51 }
  0xb8   : > { %1619 = vmatprep.subr.bf16.mxu1 %v1900_v52 }
  0xb9   : > { %1031 = vmatpush1.bf16.msra.mxu0 %v1856_v19 }
  0xba   : > { %1032 = vmatprep.subr.bf16.mxu0 %v1861_v20 }
  0xbb   : > { %1620 = vmatpush3.bf16.msra.mxu1 %v1901_v53 }
  0xbc   : > { %1621 = vmatprep.subr.bf16.mxu1 %v1902_v54 }
  0xbd   : > { %1033 = vmatpush1.bf16.msra.mxu0 %v1859_v21 }
  0xbe   : > { %1034 = vmatprep.subr.bf16.mxu0 %v1864_v22 }
  0xbf   : > { %1622 = vmatpush3.bf16.msra.mxu1 %v1903_v55 }
  0xc0   : > { %1623 = vmatprep.subr.bf16.mxu1 %v1904_v56 }
  0xc1   : > { %1035 = vmatpush1.bf16.msra.mxu0 %v1862_v23 }
  0xc2   : > { %1036 = vmatprep.subr.bf16.mxu0 %v1867_v24 }
  0xc3   : > { %1624 = vmatpush3.bf16.msra.mxu1 %v1905_v57 }
  0xc4   : > { %1625 = vmatprep.subr.bf16.mxu1 %v1906_v58 }
  0xc5   : > { %1037 = vmatpush1.bf16.msra.mxu0 %v1865_v25 }
  0xc6   : > { %1038 = vmatprep.subr.bf16.mxu0 %v1870_v26 }
  0xc7   : > { %1626 = vmatpush3.bf16.msra.mxu1 %v1907_v59 }
  0xc8   : > { %1642 = vmatprep.subr.bf16.mxu1 %v2104_v60 }
  0xc9   : > { %1039 = vmatpush2.bf16.msra.mxu0 %v1868_v27  ;;  %v1908_v27 = vld [vmem:[#allocation8 + $0x38] sm:$0xff]  }
  0xca   : > { %1040 = vmatprep.subr.bf16.mxu0 %v1873_v28 }
  0xcd   : > { %1041 = vmatpush2.bf16.msra.mxu0 %v1871_v29  ;;  %v1909_v29 = vld [vmem:[#allocation8 + $0x30] sm:$0xff]  }
  0xce   : > { %1042 = vmatprep.subr.bf16.mxu0 %v1876_v30  ;;  %v1910_v30 = vld [vmem:[#allocation8 + $0x28] sm:$0xff]  }
  0xd1   : > { %1043 = vmatpush2.bf16.msra.mxu0 %v1874_v31  ;;  %v1911_v31 = vld [vmem:[#allocation8 + $0x20] sm:$0xff]  }
  0xd2   : > { %1044 = vmatprep.subr.bf16.mxu0 %v1879_v32  ;;  %v1912_v32 = vld [vmem:[#allocation8 + $0x18] sm:$0xff]  }
  0xd5   : > { %1045 = vmatpush2.bf16.msra.mxu0 %v1877_v33  ;;  %v1913_v33 = vld [vmem:[#allocation8 + $0x10] sm:$0xff]  }
  0xd6   : > { %1046 = vmatprep.subr.bf16.mxu0 %v1882_v34  ;;  %v1914_v34 = vld [vmem:[#allocation8 + $0x8] sm:$0xff]  }
  0xd9   : > { %1047 = vmatpush2.bf16.msra.mxu0 %v1880_v35  ;;  %v1915_v35 = vld [vmem:[#allocation8] sm:$0xff]  }
  0xda   : > { %1048 = vmatprep.subr.bf16.mxu0 %v1885_v36 }
  0xdd   : > { %1049 = vmatpush2.bf16.msra.mxu0 %v1883_v37  ;;  %v1581_v37 = vld [vmem:[%s2358_s4] ss:$0 sm:$0xff] }
  0xde   : > { %1050 = vmatprep.subr.bf16.mxu0 %v1888_v38 }
  0xe1   : > { %1051 = vmatpush2.bf16.msra.mxu0 %v1886_v39 }
  0xe2   : > { %1052 = vmatprep.subr.bf16.mxu0 %v1891_v40 }
  0xe5   : > { %1053 = vmatpush2.bf16.msra.mxu0 %v1889_v41 }
  0xe8   : > { %1055 = vmatmul.mubr.bf16.vlgmr.msra.gmra.mxu0 %v350_v43 }
 0x168   : > { %v974_v61 = vpop.f32.mrf.mxu0 }
 0x169   : > { %v1015_v63 = vpop.f32.mrf.mxu1  ;;  %v975_v12 = vadd.f32 %v974_v61, %v453_v10 }
 0x16a   : > { %v976_v62 = vpop.f32.mrf.mxu0 }
 0x16b   : > { %v1017_v1 = vpop.f32.mrf.mxu1  ;;  %v977_v13 = vadd.f32 %v976_v62, %v457_v11  ;;  %v1016_v14 = vadd.f32 %v1015_v63, %v975_v12 }
 0x16c   : > { %v978_v0 = vpop.f32.mrf.mxu0 }
 0x16d   : > { %v1019_v3 = vpop.f32.mrf.mxu1  ;;  %v1018_v16 = vadd.f32 %v1017_v1, %v977_v13 }
 0x16e   : > { %v979_v2 = vpop.f32.mrf.mxu0 }
 0x16f   : > { %v1020_v4 = vpop.f32.mrf.mxu1 }
 0x1a8   : > { %v1056_v15 = vpop.f32.mrf.mxu0 }
 0x1a9   : > { %v1057_v17 = vadd.f32 %v1056_v15, %v1016_v14 }
 0x1aa   : > { %v1058_v18 = vpop.f32.mrf.mxu0 }
 0x1ab   : > { %v1063_v19 = vmul.f32 0.01, %v1057_v17  ;;  %v1059_v20 = vadd.f32 %v1058_v18, %v1018_v16 }
 0x1ac   : > { %v1060_v21 = vpop.f32.mrf.mxu0 }
 0x1ad   : > { %v1064_v22 = vmul.f32 0.01, %v1059_v20  ;;  %v1065_v23 = vmax.f32 %v1057_v17, %v1063_v19 }
 0x1ae   : > { %v1061_v24 = vpop.f32.mrf.mxu0 }
 0x1af   : > { %v1066_v25 = vmax.f32 %v1059_v20, %v1064_v22  ;;  %v1067_v28 = vpack.c.bf16 %v1065_v23, %v1065_v23 }
 0x1b1   : > { %v1068_v26 = vpack.c.bf16 %v1066_v25, %v1066_v25 }
 0x1b3   : > { %1236 = vmatprep.mubr.bf16.mxu1 %v1068_v26 }
 0x1b4   : > { %1237 = vmatmul.mubr.bf16.vlgmr.msra.gmra.mxu1 %v1067_v28 }
 0x1b5   : > { %1643 = vmatpush3.bf16.msra.mxu1 %v1908_v27  ;;  %1658 = vmatprep.mubr.msk.bf16.mxu1 %vm2105_vm0, %v2104_v60 }
 0x1b6   : > { %1644 = vmatprep.subr.bf16.mxu1 %v2104_v60 }
 0x1b9   : > { %1645 = vmatpush3.bf16.msra.mxu1 %v1909_v29 }
 0x1ba   : > { %1646 = vmatprep.subr.bf16.mxu1 %v2104_v60 }
 0x1bd   : > { %1647 = vmatpush3.bf16.msra.mxu1 %v1910_v30 }
 0x1be   : > { %1648 = vmatprep.subr.bf16.mxu1 %v2104_v60 }
 0x1c1   : > { %1649 = vmatpush3.bf16.msra.mxu1 %v1911_v31 }
 0x1c2   : > { %1650 = vmatprep.subr.bf16.mxu1 %v2104_v60 }
 0x1c5   : > { %1651 = vmatpush3.bf16.msra.mxu1 %v1912_v32 }
 0x1c6   : > { %1652 = vmatprep.subr.bf16.mxu1 %v2104_v60 }
 0x1c9   : > { %1653 = vmatpush3.bf16.msra.mxu1 %v1913_v33 }
 0x1ca   : > { %1654 = vmatprep.subr.bf16.mxu1 %v2104_v60 }
 0x1cd   : > { %1655 = vmatpush3.bf16.msra.mxu1 %v1914_v34 }
 0x1ce   : > { %1656 = vmatprep.subr.bf16.mxu1 %v2104_v60 }
 0x1d1   : > { %1657 = vmatpush3.bf16.msra.mxu1 %v1915_v35 }
 0x274   : > { %v1627_v36 = vpop.f32.mrf.mxu1 }
 0x276   : > { %v1628_v38 = vpop.f32.mrf.mxu1 }
 0x277   : > { %v1629_v39 = vadd.f32 %v1628_v38, %v1627_v36 }
 0x278   : > { %v1630_v40 = vpop.f32.mrf.mxu1 }
 0x279   : > { %v1239_v41 = vadd.f32 %v1629_v39, %v1581_v37 }
 0x27a   : > { %v1631_v42 = vpop.f32.mrf.mxu1 }
 0x27b   : > { %v1244_v43 = vmul.f32 0.01, %v1239_v41 }
 0x27d   : > { %v1245_v44 = vmax.f32 %v1239_v41, %v1244_v43 }
 0x27f   : > { %v1246_v45 = vpack.c.bf16 %v1245_v44, %v1245_v44 }
 0x281   : > { %1659 = vmatmul.mubr.bf16.vlgmr.msra.gmra.mxu1 %v1246_v45 }
 0x341   : > { %v1352_v47 = vpop.f32.mrf.mxu1 }
 0x342   : > { %v1353_v48 = vadd.f32 %v1598_v46, %v1352_v47 }
 0x343   : > { %v1660_v49 = vpop.f32.mrf.mxu1 }
 0x344   : > { %v1358_v50 = vpack.c.bf16 %v1353_v48, %v1353_v48 }
 0x345   : > { %v1355_v51 = vpop.f32.mrf.mxu1 }
 0x346   : > { %1359 = vst [vmem:[%s338_s23] sm:$0xf] %v1358_v50 }
 0x347   : > { %v1661_v52 = vpop.f32.mrf.mxu1 }
 0x348   : > { %2035 = shalt.err (!%p2032_p9)
}
 0x349   : > { %s2036_s9 = scalar_lea.hbm %s2311_s17, 64  ;;  %s2040_s11 = scalar_lea.hbm %s2361_s7, 128 }
 0x34a   : > { %p2037_p13 = scmp.ne.s32.totalorder %s2311_s17, %s2036_s9  ;;  %p2041_p8 = scmp.lt.s32.totalorder %s2311_s17, %s2361_s7 }
 0x34b   : > { %p2042_p6 = scmp.lt.s32.totalorder %s2040_s11, %s2036_s9 }
 0x34c   : > { %p2038_p7 = pnand %p2037_p13, %p2383_p0 }
 0x34d   : > { %p2043_p3 = por %p2042_p6, %p2041_p8 }
 0x34e   : > { %p2039_p4 = pneg %p2038_p7 }
 0x350   : > { %p2044_p12 = pnand %p2043_p3, %p2039_p4 }
 0x352   : > { %2047 = shalt.err (!%p2044_p12)
}
 0x353   : > { %1679 = dma.vmem_to_hbm [thread:$0]  (%p2383_p0), %s2313_s29, 64, %s2311_s17, %s1361_s18  }
 0x354 PF: > { %s1386_s22 = sand.u32 1, %s2082_s24   ;;  %p2384_p5 = scmp.ne.s32.totalorder %s2369_s8, 0 }
 0x355   : > { %p2385_p10 = scmp.ge.s32.totalorder %s2094_s27, 2  ;;  %s1387_s23 = scalar_lea.sflag [#allocation4], %s1386_s22 }
 0x357   : > { %p1696_p1 = pnand %p2385_p10, %p2384_p5 }
 0x359   : > { %p1697_p2 = pneg %p1696_p1 }
 0x35b   : > { %2077 = dma.done.wait (%p1697_p2), %s1387_s23, 64  }
 0x35c   : > { %2079 = vsyncadd (%p1697_p2), %s1387_s23, 4294967232  ;;  %p22_p11 = scmp.ge.s32.totalorder %s2219_s13, 4   ;;  %s2386_s24 = smov %s2086_s25 }
 0x35d   : > { %s2387_s25 = smov %s2090_s26  ;;  %s2388_s26 = smov %s2237_s12 }
 0x35e   : > { %s2389_s27 = smov %s2219_s13  ;;  %24 = sbr.rel (!%p22_p11) target bundleno = 10 (0xa), region = 105 }
 0x363   :  { %1392 = vsyncpa [#allocation3], 1 }
 0x364   :  { %1394 = vsyncpa [#allocation3 + $0x1], 1 }
 0x365   :  { %1395 = vsyncpa [#allocation6], 1 }
 0x366   :  { %1396 = vsyncpa [#allocation9], 1 }
 0x367   :  { %1397 = vsyncpa [#allocation4], 1 }
 0x368   :  { %1399 = vsyncpa [#allocation4 + $0x1], 1 }

</bundles_post_ra>
